<compile_context>
chip_gen: v5e
topology: v5e:2x2
jax: 0.10.0
libtpu: 0.0.40
codegen_flags: <defaults>
</compile_context>

<pallas_src>
import jax
import jax.numpy as jnp
from jax.experimental import pallas as pl
from jax.experimental.pallas import tpu as pltpu


# ----------------------------------------------------------------------------
# Kernel
# ----------------------------------------------------------------------------
def policy_kernel(s_ref, w1_ref, b1_ref, w2_ref, b2_ref, wh_ref, bh_ref,
                  out_ref):
    """One batch tile: relu(fc1) -> relu(fc2) -> fused [mean || std] head.

    Weights are pre-transposed to (in, out); biases are always f32 (they never
    touch the MXU).  All matmuls accumulate in f32 on the MXU.
    """
    x = s_ref[...]                                   # (TB, S) compute dtype
    cdt = x.dtype

    h1 = jnp.dot(x, w1_ref[...], preferred_element_type=jnp.float32)
    h1 = jnp.maximum(h1 + b1_ref[...], 0.0).astype(cdt)

    h2 = jnp.dot(h1, w2_ref[...], preferred_element_type=jnp.float32)
    h2 = jnp.maximum(h2 + b2_ref[...], 0.0).astype(cdt)

    heads = jnp.dot(h2, wh_ref[...], preferred_element_type=jnp.float32)
    out_ref[...] = (heads + bh_ref[...]).astype(out_ref.dtype)


# ----------------------------------------------------------------------------
# One-time parameter packing (hoisted out of the hot path)
# ----------------------------------------------------------------------------
def prepare_params(params, *, compute_dtype=jnp.float32):
    """Pack the Policy parameters for the kernel.  Call ONCE, reuse forever.

    * Fuses the mean/std heads into a single (H, out_pad) weight, zero-padded
      on the lane axis to a multiple of 128 so the kernel output block is
      lane-dense (unmasked vst); the wrapper slices mean/std back out.
    * Casts MXU weights to `compute_dtype` once; biases stay f32.
    """
    w1, w2 = params["w1"], params["w2"]
    S, H = w1.shape
    A = params["wm"].shape[1]
    out_pad = max(128, pl.cdiv(2 * A, 128) * 128)

    wh = jnp.zeros((H, out_pad), jnp.float32)
    wh = wh.at[:, :A].set(params["wm"]).at[:, A:2 * A].set(params["ws"])
    bh = jnp.zeros((1, out_pad), jnp.float32)
    bh = bh.at[:, :A].set(params["bm"]).at[:, A:2 * A].set(params["bs"])

    cdt = jnp.dtype(compute_dtype)
    return dict(
        w1=w1.astype(cdt), b1=params["b1"].astype(jnp.float32),
        w2=w2.astype(cdt), b2=params["b2"].astype(jnp.float32),
        wh=wh.astype(cdt), bh=bh,                       # bh stays f32
        state_size=S, hidden_size=H, action_size=A,
        out_pad=out_pad, compute_dtype=cdt,
    )


# ----------------------------------------------------------------------------
# Tile selection
# ----------------------------------------------------------------------------
def _num_tensorcores():
    """Parallel grid steps to expose: 2 on v7x-class (2 TCs/chip), else 1."""
    try:
        d = jax.devices()[0]
        kind = (getattr(d, "device_kind", "") or "").lower()
        if "v7" in kind:
            return 2
        return max(int(getattr(d, "num_cores", 1) or 1), 1)
    except Exception:
        return 1


def _pick_tile_b(B, S, out_pad, compute_dtype, *, num_parallel=1,
                 vmem_budget=24 << 20):
    """Batch tile that (a) yields `num_parallel` equal grid steps when possible
    (one big step on single-TC v5e/v6e, B/2 on v7x), (b) respects the
    (8,128)/(16,128) sublane rule, and (c) keeps the double-buffered
    activation + output blocks inside a v7x-safe VMEM budget."""
    itemsize = jnp.dtype(compute_dtype).itemsize
    sub = 16 if itemsize == 2 else 8

    def fits(tb):
        return 2 * tb * S * itemsize + 2 * tb * out_pad * 4 <= vmem_budget

    def legal(tb):
        return tb > 0 and B % tb == 0 and (tb == B or tb % sub == 0)

    cands = []
    if num_parallel > 1 and B % num_parallel == 0:
        cands.append(B // num_parallel)
    cands.append(B)
    divs, i = set(), 1
    while i * i <= B:
        if B % i == 0:
            divs.add(i)
            divs.add(B // i)
        i += 1
    cands += sorted(divs, reverse=True)

    for tb in cands:
        if legal(tb) and fits(tb):
            return tb
    return B  # degenerate batches: single step (vmem_limit handles the rest)


# ----------------------------------------------------------------------------
# Forward pass
# ----------------------------------------------------------------------------
def policy_forward(s, packed, *, tile_b=None):
    """s: (B, S) activations; packed: output of prepare_params()."""
    B, S = s.shape
    H = packed["hidden_size"]
    A = packed["action_size"]
    out_pad = packed["out_pad"]
    cdt = packed["compute_dtype"]
    itemsize = cdt.itemsize

    if tile_b is None:
        tile_b = _pick_tile_b(B, S, out_pad, cdt,
                              num_parallel=_num_tensorcores())
    assert B % tile_b == 0, "batch must be divisible by tile_b"
    grid = (B // tile_b,)

    # Constant-index weight blocks never change across the grid; single-buffer
    # them once double-buffering would waste meaningful VMEM (matters on v7x's
    # 64 MiB at realistic hidden sizes; keep the safe default at tiny sizes).
    wbytes = (S * H + H * H + H * out_pad) * itemsize + (2 * H + out_pad) * 4
    weight_mode = pl.Buffered(1) if wbytes >= (1 << 20) else None
    wbuf = 1 if weight_mode is not None else 2

    def full(shape):
        return pl.BlockSpec(shape, lambda i: (0, 0), pipeline_mode=weight_mode)

    needed = (wbytes * wbuf
              + 2 * tile_b * S * itemsize        # double-buffered activations
              + 2 * tile_b * out_pad * 4)        # double-buffered f32 output
    vmem_limit = int(min(max(needed * 5 // 4, 16 << 20), 56 << 20))

    cost = pl.CostEstimate(
        flops=2 * B * (S * H + H * H + H * 2 * A),
        transcendentals=0,
        bytes_accessed=int(B * S * itemsize + wbytes + B * 2 * A * 4),
    )

    out = pl.pallas_call(
        policy_kernel,
        out_shape=jax.ShapeDtypeStruct((B, out_pad), jnp.float32),
        grid_spec=pltpu.PrefetchScalarGridSpec(
            num_scalar_prefetch=0,
            grid=grid,
            in_specs=[
                pl.BlockSpec((tile_b, S), lambda i: (i, 0)),   # activations
                full((S, H)), full((1, H)),                    # fc1
                full((H, H)), full((1, H)),                    # fc2
                full((H, out_pad)), full((1, out_pad)),        # fused heads
            ],
            out_specs=pl.BlockSpec((tile_b, out_pad), lambda i: (i, 0)),
        ),
        compiler_params=pltpu.CompilerParams(
            dimension_semantics=("parallel",),
            vmem_limit_bytes=vmem_limit),
        cost_estimate=cost,
    )(s.astype(cdt),
      packed["w1"], packed["b1"],
      packed["w2"], packed["b2"],
      packed["wh"], packed["bh"])

    return out[:, :A], out[:, A:2 * A]


# ----------------------------------------------------------------------------
# Init + pure-JAX reference (mirrors the PyTorch module)
# ----------------------------------------------------------------------------
def init_policy_params(key, state_size, hidden_size, action_size):
    """Deterministic synthetic init (PyTorch Linear-style uniform bounds)."""
    S, H, A = state_size, hidden_size, action_size
    ks = jax.random.split(key, 8)

    def lin(kw, kb, fan_in, fan_out):
        bound = 1.0 / jnp.sqrt(fan_in)
        # stored as (in, out) — i.e. PyTorch weight transposed
        w = jax.random.uniform(kw, (fan_in, fan_out), jnp.float32, -bound, bound)
        b = jax.random.uniform(kb, (1, fan_out), jnp.float32, -bound, bound)
        return w, b

    w1, b1 = lin(ks[0], ks[1], S, H)
    w2, b2 = lin(ks[2], ks[3], H, H)
    wm, bm = lin(ks[4], ks[5], H, A)
    ws, bs = lin(ks[6], ks[7], H, A)
    return dict(w1=w1, b1=b1, w2=w2, b2=b2, wm=wm, bm=bm, ws=ws, bs=bs)


def policy_ref(s, p):
    h1 = jax.nn.relu(s @ p["w1"] + p["b1"])
    h2 = jax.nn.relu(h1 @ p["w2"] + p["b2"])
    return h2 @ p["wm"] + p["bm"], h2 @ p["ws"] + p["bs"]


if __name__ == "__main__":
    state_size, hidden_size, action_size = 16, 32, 4
    batch = 16

    key = jax.random.PRNGKey(0)
    k_params, k_input = jax.random.split(key)

    params = init_policy_params(k_params, state_size, hidden_size, action_size)
    s = jax.random.normal(k_input, (batch, state_size), jnp.float32)

    mean_ref, std_ref = policy_ref(s, params)

    # f32 path (tight numerics; the right default on v5e, which has no bf16 VPU)
    packed_f32 = prepare_params(params, compute_dtype=jnp.float32)
    mean, std = policy_forward(s, packed_f32)
    jax.block_until_ready((mean, std))
    assert mean.shape == (batch, action_size) and std.shape == (batch, action_size)
    assert jnp.allclose(mean, mean_ref, atol=1e-5, rtol=1e-5)
    assert jnp.allclose(std, std_ref, atol=1e-5, rtol=1e-5)

    # bf16 path (v6e/v7x MXU throughput; f32 biases + f32 MXU accumulation)
    packed_bf16 = prepare_params(params, compute_dtype=jnp.bfloat16)
    mean_bf, std_bf = policy_forward(s, packed_bf16)
    jax.block_until_ready((mean_bf, std_bf))
    assert jnp.allclose(mean_bf, mean_ref, atol=5e-2, rtol=5e-2)
    assert jnp.allclose(std_bf, std_ref, atol=5e-2, rtol=5e-2)

    print("KERNEL_OK")
</pallas_src>

<mosaic_0001>
module attributes {stable_mosaic.version = 11 : i64} {
  func.func @policy_kernel(%arg0: i32, %arg1: memref<16x16xf32, #tpu.memory_space<vmem>>, %arg2: memref<16x32xf32, #tpu.memory_space<vmem>>, %arg3: memref<1x32xf32, #tpu.memory_space<vmem>>, %arg4: memref<32x32xf32, #tpu.memory_space<vmem>>, %arg5: memref<1x32xf32, #tpu.memory_space<vmem>>, %arg6: memref<32x128xf32, #tpu.memory_space<vmem>>, %arg7: memref<1x128xf32, #tpu.memory_space<vmem>>, %arg8: memref<16x128xf32, #tpu.memory_space<vmem>>) attributes {dimension_semantics = [#tpu.dimension_semantics<parallel>], iteration_bounds = array<i64: 1>, scalar_prefetch = 0 : i64, scratch_operands = 0 : i64, tpu.core_type = #tpu.core_type<tc>, window_params = [{transform_indices = @transform_0, window_bounds = array<i64: 16, 16>}, {pipeline_mode = #tpu.pipeline_mode<synchronous>, transform_indices = @transform_1, window_bounds = array<i64: 16, 32>}, {pipeline_mode = #tpu.pipeline_mode<synchronous>, transform_indices = @transform_2, window_bounds = array<i64: 1, 32>}, {pipeline_mode = #tpu.pipeline_mode<synchronous>, transform_indices = @transform_3, window_bounds = array<i64: 32, 32>}, {pipeline_mode = #tpu.pipeline_mode<synchronous>, transform_indices = @transform_4, window_bounds = array<i64: 1, 32>}, {pipeline_mode = #tpu.pipeline_mode<synchronous>, transform_indices = @transform_5, window_bounds = array<i64: 32, 128>}, {pipeline_mode = #tpu.pipeline_mode<synchronous>, transform_indices = @transform_6, window_bounds = array<i64: 1, 128>}, {transform_indices = @transform_7, window_bounds = array<i64: 16, 128>}]} {
    %c0 = arith.constant 0 : index
    %c0_0 = arith.constant 0 : index
    %0 = vector.load %arg1[%c0, %c0_0] : memref<16x16xf32, #tpu.memory_space<vmem>>, vector<16x16xf32>
    %c0_1 = arith.constant 0 : index
    %c0_2 = arith.constant 0 : index
    %1 = vector.load %arg2[%c0_1, %c0_2] : memref<16x32xf32, #tpu.memory_space<vmem>>, vector<16x32xf32>
    %cst = arith.constant dense<0.000000e+00> : vector<16x32xf32>
    %2 = tpu.matmul %0, %1, %cst {dimension_numbers = #tpu.dot_dimension_numbers<[1], [0], [0], [1], [0, 0, 1, 1], [], []>} : vector<16x16xf32>, vector<16x32xf32>, vector<16x32xf32> -> vector<16x32xf32>
    %c0_3 = arith.constant 0 : index
    %c0_4 = arith.constant 0 : index
    %3 = vector.load %arg3[%c0_3, %c0_4] : memref<1x32xf32, #tpu.memory_space<vmem>>, vector<1x32xf32>
    %4 = vector.broadcast %3 : vector<1x32xf32> to vector<16x32xf32>
    %5 = arith.addf %2, %4 : vector<16x32xf32>
    %cst_5 = arith.constant 0.000000e+00 : f32
    %6 = vector.broadcast %cst_5 : f32 to vector<16x32xf32>
    %7 = arith.maximumf %5, %6 : vector<16x32xf32>
    %c0_6 = arith.constant 0 : index
    %c0_7 = arith.constant 0 : index
    %8 = vector.load %arg4[%c0_6, %c0_7] : memref<32x32xf32, #tpu.memory_space<vmem>>, vector<32x32xf32>
    %cst_8 = arith.constant dense<0.000000e+00> : vector<16x32xf32>
    %9 = tpu.matmul %7, %8, %cst_8 {dimension_numbers = #tpu.dot_dimension_numbers<[1], [0], [0], [1], [0, 0, 1, 1], [], []>} : vector<16x32xf32>, vector<32x32xf32>, vector<16x32xf32> -> vector<16x32xf32>
    %c0_9 = arith.constant 0 : index
    %c0_10 = arith.constant 0 : index
    %10 = vector.load %arg5[%c0_9, %c0_10] : memref<1x32xf32, #tpu.memory_space<vmem>>, vector<1x32xf32>
    %11 = vector.broadcast %10 : vector<1x32xf32> to vector<16x32xf32>
    %12 = arith.addf %9, %11 : vector<16x32xf32>
    %cst_11 = arith.constant 0.000000e+00 : f32
    %13 = vector.broadcast %cst_11 : f32 to vector<16x32xf32>
    %14 = arith.maximumf %12, %13 : vector<16x32xf32>
    %c0_12 = arith.constant 0 : index
    %c0_13 = arith.constant 0 : index
    %15 = vector.load %arg6[%c0_12, %c0_13] : memref<32x128xf32, #tpu.memory_space<vmem>>, vector<32x128xf32>
    %cst_14 = arith.constant dense<0.000000e+00> : vector<16x128xf32>
    %16 = tpu.matmul %14, %15, %cst_14 {dimension_numbers = #tpu.dot_dimension_numbers<[1], [0], [0], [1], [0, 0, 1, 1], [], []>} : vector<16x32xf32>, vector<32x128xf32>, vector<16x128xf32> -> vector<16x128xf32>
    %c0_15 = arith.constant 0 : index
    %c0_16 = arith.constant 0 : index
    %17 = vector.load %arg7[%c0_15, %c0_16] : memref<1x128xf32, #tpu.memory_space<vmem>>, vector<1x128xf32>
    %18 = vector.broadcast %17 : vector<1x128xf32> to vector<16x128xf32>
    %19 = arith.addf %16, %18 : vector<16x128xf32>
    %c0_17 = arith.constant 0 : index
    %c0_18 = arith.constant 0 : index
    %20 = vector.load %arg8[%c0_17, %c0_18] : memref<16x128xf32, #tpu.memory_space<vmem>>, vector<16x128xf32>
    tpu.vector_store %arg8[%c0_17, %c0_18], %19 {strides = array<i32>} : memref<16x128xf32, #tpu.memory_space<vmem>>, vector<16x128xf32>,
    return
  }
  func.func @transform_0(%arg0: i32) -> (i32, i32) {
    %c0_i32 = arith.constant 0 : i32
    %c0_i32_0 = arith.constant 0 : i32
    return %arg0, %c0_i32 : i32, i32
  }
  func.func @transform_1(%arg0: i32) -> (i32, i32) {
    %c0_i32 = arith.constant 0 : i32
    %c0_i32_0 = arith.constant 0 : i32
    %c0_i32_1 = arith.constant 0 : i32
    return %c0_i32, %c0_i32_0 : i32, i32
  }
  func.func @transform_2(%arg0: i32) -> (i32, i32) {
    %c0_i32 = arith.constant 0 : i32
    %c0_i32_0 = arith.constant 0 : i32
    %c0_i32_1 = arith.constant 0 : i32
    return %c0_i32, %c0_i32_0 : i32, i32
  }
  func.func @transform_3(%arg0: i32) -> (i32, i32) {
    %c0_i32 = arith.constant 0 : i32
    %c0_i32_0 = arith.constant 0 : i32
    %c0_i32_1 = arith.constant 0 : i32
    return %c0_i32, %c0_i32_0 : i32, i32
  }
  func.func @transform_4(%arg0: i32) -> (i32, i32) {
    %c0_i32 = arith.constant 0 : i32
    %c0_i32_0 = arith.constant 0 : i32
    %c0_i32_1 = arith.constant 0 : i32
    return %c0_i32, %c0_i32_0 : i32, i32
  }
  func.func @transform_5(%arg0: i32) -> (i32, i32) {
    %c0_i32 = arith.constant 0 : i32
    %c0_i32_0 = arith.constant 0 : i32
    %c0_i32_1 = arith.constant 0 : i32
    return %c0_i32, %c0_i32_0 : i32, i32
  }
  func.func @transform_6(%arg0: i32) -> (i32, i32) {
    %c0_i32 = arith.constant 0 : i32
    %c0_i32_0 = arith.constant 0 : i32
    %c0_i32_1 = arith.constant 0 : i32
    return %c0_i32, %c0_i32_0 : i32, i32
  }
  func.func @transform_7(%arg0: i32) -> (i32, i32) {
    %c0_i32 = arith.constant 0 : i32
    %c0_i32_0 = arith.constant 0 : i32
    return %arg0, %c0_i32 : i32, i32
  }
}

</mosaic_0001>

<bundles_post_ra>
// kernel: tpu_custom_call.1
= control target key start
LH: loop header
LB: loop body
LE: loop exit
PB: predicated region body
PF: predicated region fallthrough
CT: control target
= control target key end

     0   :  { %12 = vsyncpa [#allocation3], 0  ;;  %s468_s0 = inlined_call_operand.hbm [shape: f32[16,16], index: 0, kind: input, shape index: {}]   ;;  %s469_s1 = inlined_call_operand.hbm [shape: f32[16,32], index: 1, kind: input, shape index: {}]   ;;  %s470_s2 = inlined_call_operand.vmem [shape: f32[1,32], index: 2, kind: input, shape index: {}]   ;;  %s471_s3 = inlined_call_operand.hbm [shape: f32[32,32], index: 3, kind: input, shape index: {}]   ;;  %s472_s4 = inlined_call_operand.vmem [shape: f32[1,32], index: 4, kind: input, shape index: {}]   ;;  %s473_s5 = inlined_call_operand.hbm [shape: f32[32,128], index: 5, kind: input, shape index: {}]   ;;  %s474_s6 = inlined_call_operand.vmem [shape: f32[1,128], index: 6, kind: input, shape index: {}]   ;;  %s475_s7 = inlined_call_operand.hbm [shape: f32[16,128], index: 7, kind: output, shape index: {}]  }
   0x1   :  { %13 = vsyncpa [#allocation6], 0 }
   0x2   :  { %14 = vsyncpa [#allocation9], 0 }
   0x3   :  { %15 = vsyncpa [#allocation4], 0  ;;  %s33_s26 = sshll.u32 %s469_s1, 4  ;;  %s378_s27 = smov [#allocation5]   ;;  %s34_s26 = int_to_ptr.hbm [resolvable:$true] %s33_s26 }
   0x4   :  { %s35_s28 = sshll.u32 %s378_s27, 4  ;;  %s20_s8 = sshll.u32 %s468_s0, 4  ;;  %s36_s28 = int_to_ptr.vmem [resolvable:$true] %s35_s28  ;;  %s21_s8 = int_to_ptr.hbm [resolvable:$true] %s20_s8 }
   0x5   :  { %s379_s9 = smov 128   ;;  %s380_s10 = smov 8  }
   0x6   :  { %41 = dma.hbm_to_vmem [thread:$0]  %s34_s26, 256, %s36_s28, [#allocation6], %s379_s9, %s379_s9, %s380_s10  }
   0x7   :  { %s381_s11 = smov [#allocation2]   ;;  %s48_s1 = sshll.u32 %s471_s3, 4  ;;  %s49_s1 = int_to_ptr.hbm [resolvable:$true] %s48_s1 }
   0x8   :  { %s22_s12 = sshll.u32 %s381_s11, 4  ;;  %s63_s16 = sshll.u32 %s473_s5, 4  ;;  %s23_s12 = int_to_ptr.vmem [resolvable:$true] %s22_s12  ;;  %s64_s16 = int_to_ptr.hbm [resolvable:$true] %s63_s16 }
   0x9   :  { %28 = dma.hbm_to_vmem [thread:$0]  %s21_s8, 256, %s23_s12, [#allocation3], %s379_s9, %s379_s9, %s380_s10  }
   0xa   :  { %s382_s17 = smov [#allocation7]   ;;  %s383_s19 = smov [#allocation8]  }
   0xb   :  { %s50_s18 = sshll.u32 %s382_s17, 4  ;;  %s65_s3 = sshll.u32 %s383_s19, 4  ;;  %s51_s18 = int_to_ptr.vmem [resolvable:$true] %s50_s18  ;;  %s66_s3 = int_to_ptr.vmem [resolvable:$true] %s65_s3 }
   0xc   :  { %56 = dma.hbm_to_vmem [thread:$0]  %s49_s1, 512, %s51_s18, [#allocation6], %s379_s9, %s379_s9, %s380_s10  }
   0xd   :  { %71 = dma.hbm_to_vmem [thread:$0]  %s64_s16, 512, %s66_s3, [#allocation9], %s379_s9, %s379_s9, %s380_s10  }
   0xe   :  { %370 = dma.done.wait [#allocation3], 256  }
   0xf   :  { %371 = vsyncadd [#allocation3], 4294967040 }
  0x10   :  { %372 = dma.done.wait [#allocation6], 768  }
  0x11   :  { %373 = vsyncadd [#allocation6], 4294966528 }
  0x12   :  { %374 = dma.done.wait [#allocation9], 512  }
  0x13   :  { %375 = vsyncadd [#allocation9], 4294966784  ;;  %v93_v0 = vld [vmem:[#allocation5 + $0x8] sm:$0xff]  ;;  %v92_v1 = vld [vmem:[#allocation5] sm:$0xff]  ;;  %vm98_vm0 = vcmask 130048   ;;  %vm138_vm1 = vcmask 261120  }
  0x14   :  { %119 = vmatpush.msra.mxu0 %v93_v0  ;;  %v90_v2 = vld [vmem:[#allocation2] sm:$0xff]  ;;  %v133_v3 = vld [vmem:[#allocation7 + $0x18] sm:$0xff]  ;;  %v91_v4 = vld [vmem:[#allocation2 + $0x8] sm:$0xff]  ;;  %s384_s24 = smov [#allocation10]   ;;  %s215_s27 = sshll.u32 %s475_s7, 4  ;;  %s216_s27 = int_to_ptr.hbm [resolvable:$true] %s215_s27 }
  0x15   :  { %157 = vmatpush.msra.mxu1 %v133_v3  ;;  %236 = vmatpush.msra.mxu3 %v133_v3  ;;  %v132_v5 = vld [vmem:[#allocation7 + $0x10] sm:$0xff]  ;;  %v131_v6 = vld [vmem:[#allocation7 + $0x8] sm:$0xff]  ;;  %v130_v7 = vld [vmem:[#allocation7] sm:$0xff]  ;;  %s213_s25 = sshll.u32 %s384_s24, 4  ;;  %s214_s25 = int_to_ptr.vmem [resolvable:$true] %s213_s25 }
  0x16   :  { %120 = vmatpush.msra.mxu0 %v92_v1  ;;  %v173_v8 = vld [vmem:[#allocation8 + $0x18] sm:$0xff]  ;;  %v247_v9 = vld [vmem:[%s470_s2] ss:$0 sm:$0xff]  ;;  %v172_v16 = vld [vmem:[#allocation8 + $0x10] sm:$0xff] }
  0x17   :  { %230 = vmatmul.msk.f32.vlgmr.msra.gmra.mxu0 %vm98_vm0, %v90_v2  ;;  %158 = vmatpush.msra.mxu1 %v132_v5  ;;  %v171_v17 = vld [vmem:[#allocation8 + $0x8] sm:$0xff]  ;;  %v170_v18 = vld [vmem:[#allocation8] sm:$0xff] }
  0x18   :  { %237 = vmatpush.msra.mxu3 %v132_v5  ;;  %196 = vmatpush.msra.mxu2 %v173_v8  ;;  %v248_v19 = vld [vmem:[%s472_s4] ss:$0 sm:$0xff] }
  0x19   :  { %159 = vmatpush.msra.mxu1 %v131_v6  ;;  %v249_v26 = vld [vmem:[%s474_s6] ss:$0 sm:$0xff] }
  0x1a   :  { %238 = vmatpush.msra.mxu3 %v131_v6  ;;  %197 = vmatpush.msra.mxu2 %v172_v16 }
  0x1b   :  { %160 = vmatpush.msra.mxu1 %v130_v7 }
  0x1c   :  { %239 = vmatpush.msra.mxu3 %v130_v7  ;;  %198 = vmatpush.msra.mxu2 %v171_v17 }
  0x1e   :  { %199 = vmatpush.msra.mxu2 %v170_v18 }
  0x1f   :  { %231 = vmatmul.msk.f32.gmra.mxu0 %vm98_vm0, %v91_v4 }
  0x94   :  { %v122_v10 = vpop.f32.mrf.mxu0 }
  0x95   :  { %v123_v11 = vadd.f32 %v247_v9, %v122_v10 }
  0x97   :  { %v128_v12 = vmax.f32 %v123_v11, 0.0 }
  0x99   :  { %232 = vmatmul.msk.f32.vlgmr.msra.gmra.mxu1 %vm138_vm1, %v128_v12 }
  0x9c   :  { %v125_v13 = vpop.f32.mrf.mxu0 }
  0x9d   :  { %v126_v14 = vadd.f32 %v247_v9, %v125_v13 }
  0x9f   :  { %v129_v15 = vmax.f32 %v126_v14, 0.0 }
  0xa1   :  { %233 = vmatmul.msk.f32.vlgmr.msra.gmra.mxu3 %vm138_vm1, %v129_v15 }
 0x116   :  { %v162_v20 = vpop.f32.mrf.mxu1 }
 0x117   :  { %v163_v21 = vadd.f32 %v248_v19, %v162_v20 }
 0x119   :  { %v168_v22 = vmax.f32 %v163_v21, 0.0 }
 0x11b   :  { %234 = vmatmul.msk.f32.vlgmr.msra.gmra.mxu2 %vm138_vm1, %v168_v22 }
 0x124   :  { %v165_v23 = vpop.f32.mrf.mxu3 }
 0x125   :  { %v166_v24 = vadd.f32 %v248_v19, %v165_v23 }
 0x127   :  { %v169_v25 = vmax.f32 %v166_v24, 0.0 }
 0x129   :  { %235 = vmatmul.msk.f32.gmra.mxu2 %vm138_vm1, %v169_v25 }
 0x19e   :  { %v201_v27 = vpop.f32.mrf.mxu2 }
 0x19f   :  { %v202_v28 = vadd.f32 %v249_v26, %v201_v27 }
 0x1a1   :  { %207 = vst [vmem:[#allocation10] sm:$0xff] %v202_v28 }
 0x1ac   :  { %v204_v29 = vpop.f32.mrf.mxu2 }
 0x1ad   :  { %v205_v30 = vadd.f32 %v249_v26, %v204_v29 }
 0x1af   :  { %208 = vst [vmem:[#allocation10 + $0x8] sm:$0xff] %v205_v30 }
 0x1b0   :  { %221 = dma.vmem_to_hbm [thread:$0]  %s214_s25, 256, %s216_s27, [#allocation4], %s379_s9, %s379_s9, %s380_s10  }
 0x1b1   :  { %376 = dma.done.wait [#allocation4], 256  }
 0x1b2   :  { %377 = vsyncadd [#allocation4], 4294967040 }
 0x1b3   :  { %226 = vsyncpa [#allocation3], 1 }
 0x1b4   :  { %227 = vsyncpa [#allocation6], 1 }
 0x1b5   :  { %228 = vsyncpa [#allocation9], 1 }
 0x1b6   :  { %229 = vsyncpa [#allocation4], 1 }

</bundles_post_ra>
